<compile_context>
chip_gen: v7x
topology: tpu7x:2x2x1
jax: 0.10.0
libtpu: 0.0.40
codegen_flags: <defaults>
</compile_context>

<pallas_src>
import functools

import jax
import jax.numpy as jnp
from jax.experimental import pallas as pl
from jax.experimental.pallas import tpu as pltpu


def _gelu_f32(x):
    # matches torch.nn.functional.gelu (exact erf form) applied in float32
    return 0.5 * x * (1.0 + jax.lax.erf(x / jnp.sqrt(jnp.float32(2.0))))


def _round_up(a, b):
    return (a + b - 1) // b * b


def glu_kernel(x_ref, w1_ref, wg_ref, w2_ref, o_ref, acc_ref):
    f = pl.program_id(1)

    @pl.when(f == 0)
    def _():
        acc_ref[...] = jnp.zeros_like(acc_ref)

    x = x_ref[...]                                                     # (tm, E)
    # fc1 / gate projections for this FFN tile (MXU, f32 accumulation)
    h1 = jnp.dot(x, w1_ref[...], preferred_element_type=jnp.float32)  # (tm, tf)
    g = jnp.dot(x, wg_ref[...], preferred_element_type=jnp.float32)   # (tm, tf)
    # activation + gating in f32, single cast back to input dtype for fc2
    h = (_gelu_f32(h1) * g).astype(x.dtype)                           # (tm, tf)
    # accumulate this tile's fc2 contribution
    acc_ref[...] += jnp.dot(h, w2_ref[...],
                            preferred_element_type=jnp.float32)       # (tm, E)

    @pl.when(f == pl.num_programs(1) - 1)
    def _():
        o_ref[...] = acc_ref[...].astype(o_ref.dtype)


@functools.partial(jax.jit, static_argnames=("tm", "tf"))
def glu_forward(x, w_fc1, w_gate, w_fc2, *, tm=256, tf=512):
    """x: (..., embed_dim); weights are PyTorch-layout (out_features, in_features)."""
    x_shape = x.shape
    E = x_shape[-1]
    F = w_fc1.shape[0]

    x2d = x.reshape(-1, E)
    M = x2d.shape[0]

    # --- tile sizes / padded extents ---------------------------------------
    # lane dims must be multiples of 128; sublane (row) tile a multiple of 16
    # (safe for both bf16 and f32 packing).
    E_pad = _round_up(E, 128)
    tm = min(tm, _round_up(M, 16))
    tf = min(tf, _round_up(F, 128))
    M_pad = _round_up(M, tm)
    F_pad = _round_up(F, tf)

    # --- zero-pad activations and (transposed) weights ----------------------
    x_p = jnp.zeros((M_pad, E_pad), x.dtype).at[:M, :E].set(x2d)
    w1_t = jnp.zeros((E_pad, F_pad), w_fc1.dtype).at[:E, :F].set(w_fc1.T)
    wg_t = jnp.zeros((E_pad, F_pad), w_gate.dtype).at[:E, :F].set(w_gate.T)
    w2_t = jnp.zeros((F_pad, E_pad), w_fc2.dtype).at[:F, :E].set(w_fc2.T)

    grid = (M_pad // tm, F_pad // tf)

    out = pl.pallas_call(
        glu_kernel,
        out_shape=jax.ShapeDtypeStruct((M_pad, E_pad), x.dtype),
        grid_spec=pltpu.PrefetchScalarGridSpec(
            num_scalar_prefetch=0,
            grid=grid,
            in_specs=[
                pl.BlockSpec((tm, E_pad), lambda i, f: (i, 0)),   # x rows
                pl.BlockSpec((E_pad, tf), lambda i, f: (0, f)),   # W1 F-tile
                pl.BlockSpec((E_pad, tf), lambda i, f: (0, f)),   # Wg F-tile
                pl.BlockSpec((tf, E_pad), lambda i, f: (f, 0)),   # W2 F-tile
            ],
            out_specs=pl.BlockSpec((tm, E_pad), lambda i, f: (i, 0)),
            scratch_shapes=[pltpu.VMEM((tm, E_pad), jnp.float32)],
        ),
        compiler_params=pltpu.CompilerParams(
            dimension_semantics=("parallel", "arbitrary"),
            vmem_limit_bytes=64 * 1024 * 1024,
        ),
    )(x_p, w1_t, wg_t, w2_t)

    return out[:M, :E].reshape(x_shape)


def glu_reference(x, w_fc1, w_gate, w_fc2):
    x_shape = x.shape
    x2d = x.reshape(-1, x_shape[-1])
    g = x2d @ w_gate.T
    h = _gelu_f32((x2d @ w_fc1.T).astype(jnp.float32)).astype(x.dtype) * g
    out = h @ w_fc2.T
    return out.reshape(x_shape)


if __name__ == "__main__":
    # small shapes consistent with the module: (batch, seq, embed_dim)
    batch, seq, embed_dim, ffn_dim = 2, 8, 32, 64

    key = jax.random.PRNGKey(0)
    kx, k1, kg, k2 = jax.random.split(key, 4)

    x = jax.random.normal(kx, (batch, seq, embed_dim), dtype=jnp.float32)

    # deterministic Linear-style init: U(-1/sqrt(fan_in), 1/sqrt(fan_in)),
    # PyTorch weight layout (out_features, in_features), bias=False
    b1 = 1.0 / jnp.sqrt(jnp.float32(embed_dim))
    b2 = 1.0 / jnp.sqrt(jnp.float32(ffn_dim))
    w_fc1 = jax.random.uniform(k1, (ffn_dim, embed_dim), jnp.float32, -b1, b1)
    w_gate = jax.random.uniform(kg, (ffn_dim, embed_dim), jnp.float32, -b1, b1)
    w_fc2 = jax.random.uniform(k2, (embed_dim, ffn_dim), jnp.float32, -b2, b2)

    out = glu_forward(x, w_fc1, w_gate, w_fc2)
    out = jax.block_until_ready(out)

    ref = glu_reference(x, w_fc1, w_gate, w_fc2)
    assert out.shape == x.shape
    assert jnp.allclose(out, ref, atol=1e-5, rtol=1e-5), (
        float(jnp.max(jnp.abs(out - ref))))

    print("KERNEL_OK")
</pallas_src>

<mosaic_0001>
module attributes {stable_mosaic.version = 11 : i64} {
  func.func @glu_kernel(%arg0: i32, %arg1: i32, %arg2: memref<16x128xf32, #tpu.memory_space<vmem>>, %arg3: memref<128x128xf32, #tpu.memory_space<vmem>>, %arg4: memref<128x128xf32, #tpu.memory_space<vmem>>, %arg5: memref<128x128xf32, #tpu.memory_space<vmem>>, %arg6: memref<16x128xf32, #tpu.memory_space<vmem>>, %arg7: memref<16x128xf32, #tpu.memory_space<vmem>>) attributes {dimension_semantics = [#tpu.dimension_semantics<parallel>, #tpu.dimension_semantics<arbitrary>], iteration_bounds = array<i64: 1, 1>, scalar_prefetch = 0 : i64, scratch_operands = 1 : i64, tpu.core_type = #tpu.core_type<tc>, window_params = [{transform_indices = @transform_0, window_bounds = array<i64: 16, 128>}, {transform_indices = @transform_1, window_bounds = array<i64: 128, 128>}, {transform_indices = @transform_2, window_bounds = array<i64: 128, 128>}, {transform_indices = @transform_3, window_bounds = array<i64: 128, 128>}, {transform_indices = @transform_4, window_bounds = array<i64: 16, 128>}]} {
    %c0_i32 = arith.constant 0 : i32
    %0 = arith.cmpi eq, %arg1, %c0_i32 : i32
    %1 = arith.extui %0 : i1 to i32
    %c0_i32_0 = arith.constant 0 : i32
    %2 = arith.cmpi ne, %1, %c0_i32_0 : i32
    scf.if %2 {
      %cst_19 = arith.constant 0.000000e+00 : f32
      %26 = vector.broadcast %cst_19 : f32 to vector<16x128xf32>
      %c0_20 = arith.constant 0 : index
      %c0_21 = arith.constant 0 : index
      %27 = vector.load %arg7[%c0_20, %c0_21] : memref<16x128xf32, #tpu.memory_space<vmem>>, vector<16x128xf32>
      tpu.vector_store %arg7[%c0_20, %c0_21], %26 {strides = array<i32>} : memref<16x128xf32, #tpu.memory_space<vmem>>, vector<16x128xf32>,
    } else {
    }
    %c0 = arith.constant 0 : index
    %c0_1 = arith.constant 0 : index
    %3 = vector.load %arg2[%c0, %c0_1] : memref<16x128xf32, #tpu.memory_space<vmem>>, vector<16x128xf32>
    %c0_2 = arith.constant 0 : index
    %c0_3 = arith.constant 0 : index
    %4 = vector.load %arg3[%c0_2, %c0_3] : memref<128x128xf32, #tpu.memory_space<vmem>>, vector<128x128xf32>
    %cst = arith.constant dense<0.000000e+00> : vector<16x128xf32>
    %5 = tpu.matmul %3, %4, %cst {dimension_numbers = #tpu.dot_dimension_numbers<[1], [0], [0], [1], [0, 0, 1, 1], [], []>} : vector<16x128xf32>, vector<128x128xf32>, vector<16x128xf32> -> vector<16x128xf32>
    %c0_4 = arith.constant 0 : index
    %c0_5 = arith.constant 0 : index
    %6 = vector.load %arg4[%c0_4, %c0_5] : memref<128x128xf32, #tpu.memory_space<vmem>>, vector<128x128xf32>
    %cst_6 = arith.constant dense<0.000000e+00> : vector<16x128xf32>
    %7 = tpu.matmul %3, %6, %cst_6 {dimension_numbers = #tpu.dot_dimension_numbers<[1], [0], [0], [1], [0, 0, 1, 1], [], []>} : vector<16x128xf32>, vector<128x128xf32>, vector<16x128xf32> -> vector<16x128xf32>
    %cst_7 = arith.constant 5.000000e-01 : f32
    %8 = vector.broadcast %cst_7 : f32 to vector<16x128xf32>
    %9 = arith.mulf %8, %5 : vector<16x128xf32>
    %cst_8 = arith.constant 2.000000e+00 : f32
    %10 = math.sqrt %cst_8 : f32
    %11 = vector.broadcast %10 : f32 to vector<16x128xf32>
    %12 = arith.divf %5, %11 : vector<16x128xf32>
    %13 = math.erf %12 : vector<16x128xf32>
    %cst_9 = arith.constant 1.000000e+00 : f32
    %14 = vector.broadcast %cst_9 : f32 to vector<16x128xf32>
    %15 = arith.addf %14, %13 : vector<16x128xf32>
    %16 = arith.mulf %9, %15 : vector<16x128xf32>
    %17 = arith.mulf %16, %7 : vector<16x128xf32>
    %c0_10 = arith.constant 0 : index
    %c0_11 = arith.constant 0 : index
    %18 = vector.load %arg7[%c0_10, %c0_11] : memref<16x128xf32, #tpu.memory_space<vmem>>, vector<16x128xf32>
    %c0_12 = arith.constant 0 : index
    %c0_13 = arith.constant 0 : index
    %19 = vector.load %arg5[%c0_12, %c0_13] : memref<128x128xf32, #tpu.memory_space<vmem>>, vector<128x128xf32>
    %cst_14 = arith.constant dense<0.000000e+00> : vector<16x128xf32>
    %20 = tpu.matmul %17, %19, %cst_14 {dimension_numbers = #tpu.dot_dimension_numbers<[1], [0], [0], [1], [0, 0, 1, 1], [], []>} : vector<16x128xf32>, vector<128x128xf32>, vector<16x128xf32> -> vector<16x128xf32>
    %21 = arith.addf %18, %20 : vector<16x128xf32>
    %c0_15 = arith.constant 0 : index
    %c0_16 = arith.constant 0 : index
    %22 = vector.load %arg7[%c0_15, %c0_16] : memref<16x128xf32, #tpu.memory_space<vmem>>, vector<16x128xf32>
    tpu.vector_store %arg7[%c0_15, %c0_16], %21 {strides = array<i32>} : memref<16x128xf32, #tpu.memory_space<vmem>>, vector<16x128xf32>,
    %c0_i32_17 = arith.constant 0 : i32
    %23 = arith.cmpi eq, %arg1, %c0_i32_17 : i32
    %24 = arith.extui %23 : i1 to i32
    %c0_i32_18 = arith.constant 0 : i32
    %25 = arith.cmpi ne, %24, %c0_i32_18 : i32
    scf.if %25 {
      %c0_19 = arith.constant 0 : index
      %c0_20 = arith.constant 0 : index
      %26 = vector.load %arg7[%c0_19, %c0_20] : memref<16x128xf32, #tpu.memory_space<vmem>>, vector<16x128xf32>
      %c0_21 = arith.constant 0 : index
      %c0_22 = arith.constant 0 : index
      %27 = vector.load %arg6[%c0_21, %c0_22] : memref<16x128xf32, #tpu.memory_space<vmem>>, vector<16x128xf32>
      tpu.vector_store %arg6[%c0_21, %c0_22], %26 {strides = array<i32>} : memref<16x128xf32, #tpu.memory_space<vmem>>, vector<16x128xf32>,
    } else {
    }
    return
  }
  func.func @transform_0(%arg0: i32, %arg1: i32) -> (i32, i32) {
    %c0_i32 = arith.constant 0 : i32
    %c0_i32_0 = arith.constant 0 : i32
    return %arg0, %c0_i32 : i32, i32
  }
  func.func @transform_1(%arg0: i32, %arg1: i32) -> (i32, i32) {
    %c0_i32 = arith.constant 0 : i32
    %c0_i32_0 = arith.constant 0 : i32
    return %c0_i32, %arg1 : i32, i32
  }
  func.func @transform_2(%arg0: i32, %arg1: i32) -> (i32, i32) {
    %c0_i32 = arith.constant 0 : i32
    %c0_i32_0 = arith.constant 0 : i32
    return %c0_i32, %arg1 : i32, i32
  }
  func.func @transform_3(%arg0: i32, %arg1: i32) -> (i32, i32) {
    %c0_i32 = arith.constant 0 : i32
    %c0_i32_0 = arith.constant 0 : i32
    return %arg1, %c0_i32 : i32, i32
  }
  func.func @transform_4(%arg0: i32, %arg1: i32) -> (i32, i32) {
    %c0_i32 = arith.constant 0 : i32
    %c0_i32_0 = arith.constant 0 : i32
    return %arg0, %c0_i32 : i32, i32
  }
}

</mosaic_0001>

<bundles_post_ra>
// kernel: glu_forward.1
= control target key start
LH: loop header
LB: loop body
LE: loop exit
PB: predicated region body
PF: predicated region fallthrough
CT: control target
= control target key end

     0   :  { %9 = vsyncpa [#allocation4], 0  ;;  %s904_s0 = inlined_call_operand.hbm [shape: f32[16,128], index: 0, kind: input, shape index: {}]   ;;  %s905_s1 = inlined_call_operand.hbm [shape: f32[128,128], index: 1, kind: input, shape index: {}]   ;;  %s906_s2 = inlined_call_operand.hbm [shape: f32[128,128], index: 2, kind: input, shape index: {}]   ;;  %s907_s3 = inlined_call_operand.hbm [shape: f32[128,128], index: 3, kind: input, shape index: {}]   ;;  %s908_s4 = inlined_call_operand.hbm [shape: f32[16,128], index: 4, kind: output, shape index: {}]  }
   0x1   :  { %10 = vsyncpa [#allocation7], 0 }
   0x2   :  { %11 = vsyncpa [#allocation10], 0 }
   0x3   :  { %12 = vsyncpa [#allocation5], 0  ;;  %s783_s15 = smov [#allocation6]   ;;  %s784_s17 = smov [#allocation3]  }
   0x4   :  { %s30_s16 = sshll.u32 %s783_s15, 4  ;;  %s18_s18 = sshll.u32 %s784_s17, 4  ;;  %s31_s16 = int_to_ptr.vmem [resolvable:$true] %s30_s16  ;;  %s815_s18 = int_to_ptr.vmem [resolvable:$true] %s18_s18 }
   0x5   :  { %s665_s21 = scalar_lea.hbm %s905_s1, 2048 }
   0x6   :  { %p666_p0 = scmp.ne.s32.totalorder %s905_s1, %s665_s21  ;;  %p669_p1 = scmp.lt.u32.totalorder %s665_s21, %s905_s1 }
   0x8   :  { %p671_p2 = pnand %p669_p1, %p666_p0 }
   0xa   :  { %674 = shalt.err (!%p671_p2)
}
   0xb   :  { %s675_s26 = scalar_lea.vmem %s31_s16, 2048  ;;  %p680_p4 = scmp.lt.s32.totalorder %s31_s16, %s31_s16 }
   0xc   :  { %p676_p3 = scmp.ne.s32.totalorder %s31_s16, %s675_s26  ;;  %p681_p5 = scmp.lt.s32.totalorder %s675_s26, %s675_s26 }
   0xe   :  { %p682_p6 = por %p681_p5, %p680_p4 }
  0x10   :  { %p683_p7 = pnand %p682_p6, %p676_p3 }
  0x12   :  { %686 = shalt.err (!%p683_p7)
}
  0x13   :  { %s785_s27 = smov 128   ;;  %s786_s28 = smov 8  }
  0x14   :  { %36 = dma.hbm_to_vmem [thread:$0]  %s905_s1, 2048, %s31_s16, [#allocation7], %s785_s27, %s785_s27, %s786_s28  }
  0x15   :  { %s687_s7 = scalar_lea.hbm %s904_s0, 256 }
  0x16   :  { %p688_p8 = scmp.ne.s32.totalorder %s904_s0, %s687_s7  ;;  %p691_p9 = scmp.lt.u32.totalorder %s687_s7, %s904_s0 }
  0x18   :  { %p693_p10 = pnand %p691_p9, %p688_p8 }
  0x1a   :  { %696 = shalt.err (!%p693_p10)
}
  0x1b   :  { %s697_s12 = scalar_lea.vmem %s815_s18, 256  ;;  %p702_p12 = scmp.lt.s32.totalorder %s815_s18, %s815_s18 }
  0x1c   :  { %p698_p11 = scmp.ne.s32.totalorder %s815_s18, %s697_s12  ;;  %p703_p13 = scmp.lt.s32.totalorder %s697_s12, %s697_s12 }
  0x1e   :  { %p704_p0 = por %p703_p13, %p702_p12 }
  0x20   :  { %p705_p1 = pnand %p704_p0, %p698_p11 }
  0x22   :  { %708 = shalt.err (!%p705_p1)
}
  0x23   :  { %24 = dma.hbm_to_vmem [thread:$0]  %s904_s0, 256, %s815_s18, [#allocation4], %s785_s27, %s785_s27, %s786_s28  }
  0x24   :  { %s787_s14 = smov [#allocation8]   ;;  %s788_s16 = smov [#allocation9]  }
  0x25   :  { %s42_s15 = sshll.u32 %s787_s14, 4  ;;  %s54_s17 = sshll.u32 %s788_s16, 4  ;;  %s43_s15 = int_to_ptr.vmem [resolvable:$true] %s42_s15  ;;  %s852_s17 = int_to_ptr.vmem [resolvable:$true] %s54_s17 }
  0x26   :  { %s709_s21 = scalar_lea.hbm %s906_s2, 2048 }
  0x27   :  { %p710_p2 = scmp.ne.s32.totalorder %s906_s2, %s709_s21  ;;  %p713_p3 = scmp.lt.u32.totalorder %s709_s21, %s906_s2 }
  0x29   :  { %p715_p4 = pnand %p713_p3, %p710_p2 }
  0x2b   :  { %718 = shalt.err (!%p715_p4)
}
  0x2c   :  { %s719_s0 = scalar_lea.vmem %s43_s15, 2048  ;;  %p724_p6 = scmp.lt.s32.totalorder %s43_s15, %s43_s15 }
  0x2d   :  { %p720_p5 = scmp.ne.s32.totalorder %s43_s15, %s719_s0  ;;  %p725_p7 = scmp.lt.s32.totalorder %s719_s0, %s719_s0 }
  0x2f   :  { %p726_p8 = por %p725_p7, %p724_p6 }
  0x31   :  { %p727_p9 = pnand %p726_p8, %p720_p5 }
  0x33   :  { %730 = shalt.err (!%p727_p9)
}
  0x34   :  { %48 = dma.hbm_to_vmem [thread:$0]  %s906_s2, 2048, %s43_s15, [#allocation7], %s785_s27, %s785_s27, %s786_s28  }
  0x35   :  { %s731_s5 = scalar_lea.hbm %s907_s3, 2048 }
  0x36   :  { %p732_p10 = scmp.ne.s32.totalorder %s907_s3, %s731_s5  ;;  %p735_p11 = scmp.lt.u32.totalorder %s731_s5, %s907_s3 }
  0x38   :  { %p737_p12 = pnand %p735_p11, %p732_p10 }
  0x3a   :  { %740 = shalt.err (!%p737_p12)
}
  0x3b   :  { %s741_s10 = scalar_lea.vmem %s852_s17, 2048  ;;  %p746_p0 = scmp.lt.s32.totalorder %s852_s17, %s852_s17 }
  0x3c   :  { %p742_p13 = scmp.ne.s32.totalorder %s852_s17, %s741_s10  ;;  %p747_p1 = scmp.lt.s32.totalorder %s741_s10, %s741_s10 }
  0x3e   :  { %p748_p2 = por %p747_p1, %p746_p0 }
  0x40   :  { %p749_p3 = pnand %p748_p2, %p742_p13 }
  0x42   :  { %752 = shalt.err (!%p749_p3)
}
  0x43   :  { %60 = dma.hbm_to_vmem [thread:$0]  %s907_s3, 2048, %s852_s17, [#allocation10], %s785_s27, %s785_s27, %s786_s28  }
  0x44   :  { %775 = dma.done.wait [#allocation4], 256  }
  0x45   :  { %776 = vsyncadd [#allocation4], 4294967040 }
  0x46   :  { %777 = dma.done.wait [#allocation7], 4096  }
  0x47   :  { %778 = vsyncadd [#allocation7], 4294963200 }
  0x48   :  { %779 = dma.done.wait [#allocation10], 2048  }
  0x49   :  { %780 = vsyncadd [#allocation10], 4294965248  ;;  %v81_v0 = vld [vmem:[#allocation6] sm:$0xff]  ;;  %v82_v1 = vld [vmem:[#allocation6 + $0x8] sm:$0xff]  ;;  %s789_s3 = smov [#allocation11]  }
  0x4a   :  { %v83_v2 = vld [vmem:[#allocation6 + $0x10] sm:$0xff]  ;;  %v558_v3 = vpack.c.bf16 %v82_v1, %v81_v0  ;;  %v84_v4 = vld [vmem:[#allocation6 + $0x18] sm:$0xff]  ;;  %v85_v6 = vld [vmem:[#allocation6 + $0x20] sm:$0xff]  ;;  %s385_s12 = sshll.u32 %s789_s3, 4  ;;  %s386_s12 = int_to_ptr.vmem [resolvable:$true] %s385_s12 }
  0x4b   :  { %v562_v5 = vpack.c.bf16 %v84_v4, %v83_v2  ;;  %v86_v7 = vld [vmem:[#allocation6 + $0x28] sm:$0xff]  ;;  %v172_v8 = vld [vmem:[#allocation8] sm:$0xff]  ;;  %v174_v11 = vld [vmem:[#allocation8 + $0x10] sm:$0xff]  ;;  %s753_s1 = scalar_lea.vmem %s386_s12, 256  ;;  %p758_p5 = scmp.lt.s32.totalorder %s386_s12, %s386_s12 }
  0x4c   :  { %559 = vmatprep.subr.bf16.mxu0 %v558_v3  ;;  %v173_v9 = vld [vmem:[#allocation8 + $0x8] sm:$0xff]  ;;  %v566_v12 = vpack.c.bf16 %v86_v7, %v85_v6  ;;  %v87_v13 = vld [vmem:[#allocation6 + $0x30] sm:$0xff]  ;;  %v175_v14 = vld [vmem:[#allocation8 + $0x18] sm:$0xff]  ;;  %p754_p4 = scmp.ne.s32.totalorder %s386_s12, %s753_s1  ;;  %p759_p6 = scmp.lt.s32.totalorder %s753_s1, %s753_s1 }
  0x4d   :  { %561 = vmatpush3.bf16.msra.mxu0 %v558_v3  ;;  %v590_v10 = vpack.c.bf16 %v173_v9, %v172_v8  ;;  %v88_v15 = vld [vmem:[#allocation6 + $0x38] sm:$0xff]  ;;  %v594_v16 = vpack.c.bf16 %v175_v14, %v174_v11  ;;  %v176_v17 = vld [vmem:[#allocation8 + $0x20] sm:$0xff]  ;;  %v177_v18 = vld [vmem:[#allocation8 + $0x28] sm:$0xff] }
  0x4e   :  { %563 = vmatprep.subr.bf16.mxu0 %v562_v5  ;;  %v598_v19 = vpack.c.bf16 %v177_v18, %v176_v17  ;;  %v79_v20 = vld [vmem:[#allocation3] sm:$0xff]  ;;  %v570_v21 = vpack.c.bf16 %v88_v15, %v87_v13  ;;  %v179_v23 = vld [vmem:[#allocation8 + $0x38] sm:$0xff]  ;;  %v89_v24 = vld [vmem:[#allocation6 + $0x40] sm:$0xff]  ;;  %p760_p7 = por %p759_p6, %p758_p5 }
  0x4f   :  { %591 = vmatprep.subr.bf16.mxu1 %v590_v10  ;;  %v178_v22 = vld [vmem:[#allocation8 + $0x30] sm:$0xff]  ;;  %485 = vmatprep.mubr.f32.mxu0 %v79_v20  ;;  %v90_v25 = vld [vmem:[#allocation6 + $0x48] sm:$0xff]  ;;  %v180_v28 = vld [vmem:[#allocation8 + $0x40] sm:$0xff] }
  0x50   :  { %593 = vmatpush3.bf16.msra.mxu1 %v590_v10  ;;  %520 = vmatprep.mubr.f32.mxu1 %v79_v20  ;;  %v602_v26 = vpack.c.bf16 %v179_v23, %v178_v22  ;;  %v574_v27 = vpack.c.bf16 %v90_v25, %v89_v24  ;;  %v181_v29 = vld [vmem:[#allocation8 + $0x48] sm:$0xff]  ;;  %v91_v30 = vld [vmem:[#allocation6 + $0x50] sm:$0xff]  ;;  %v92_v31 = vld [vmem:[#allocation6 + $0x58] sm:$0xff]  ;;  %p761_p8 = pnand %p760_p7, %p754_p4 }
  0x51   :  { %565 = vmatpush3.bf16.msra.mxu0 %v562_v5  ;;  %595 = vmatprep.subr.bf16.mxu1 %v594_v16  ;;  %v606_v32 = vpack.c.bf16 %v181_v29, %v180_v28  ;;  %v578_v33 = vpack.c.bf16 %v92_v31, %v91_v30  ;;  %v182_v34 = vld [vmem:[#allocation8 + $0x50] sm:$0xff]  ;;  %v183_v35 = vld [vmem:[#allocation8 + $0x58] sm:$0xff]  ;;  %v93_v36 = vld [vmem:[#allocation6 + $0x60] sm:$0xff] }
  0x52   :  { %567 = vmatprep.subr.bf16.mxu0 %v566_v12  ;;  %v94_v37 = vld [vmem:[#allocation6 + $0x68] sm:$0xff]  ;;  %v610_v38 = vpack.c.bf16 %v183_v35, %v182_v34  ;;  %v184_v40 = vld [vmem:[#allocation8 + $0x60] sm:$0xff]  ;;  %v95_v42 = vld [vmem:[#allocation6 + $0x70] sm:$0xff] }
  0x53   :  { %v582_v39 = vpack.c.bf16 %v94_v37, %v93_v36  ;;  %v185_v41 = vld [vmem:[#allocation8 + $0x68] sm:$0xff]  ;;  %v96_v43 = vld [vmem:[#allocation6 + $0x78] sm:$0xff]  ;;  %v186_v46 = vld [vmem:[#allocation8 + $0x70] sm:$0xff] }
  0x54   :  { %597 = vmatpush3.bf16.msra.mxu1 %v594_v16  ;;  %v614_v44 = vpack.c.bf16 %v185_v41, %v184_v40  ;;  %v586_v45 = vpack.c.bf16 %v96_v43, %v95_v42  ;;  %v187_v47 = vld [vmem:[#allocation8 + $0x78] sm:$0xff]  ;;  %v278_v48 = vld [vmem:[#allocation9] sm:$0xff]  ;;  %v279_v49 = vld [vmem:[#allocation9 + $0x8] sm:$0xff] }
  0x55   :  { %569 = vmatpush3.bf16.msra.mxu0 %v566_v12  ;;  %599 = vmatprep.subr.bf16.mxu1 %v598_v19  ;;  %v618_v50 = vpack.c.bf16 %v187_v47, %v186_v46  ;;  %v622_v51 = vpack.c.bf16 %v279_v49, %v278_v48  ;;  %v280_v52 = vld [vmem:[#allocation9 + $0x10] sm:$0xff]  ;;  %v281_v53 = vld [vmem:[#allocation9 + $0x18] sm:$0xff]  ;;  %v282_v56 = vld [vmem:[#allocation9 + $0x20] sm:$0xff] }
  0x56   :  { %571 = vmatprep.subr.bf16.mxu0 %v570_v21  ;;  %v80_v54 = vld [vmem:[#allocation3 + $0x8] sm:$0xff]  ;;  %v626_v55 = vpack.c.bf16 %v281_v53, %v280_v52  ;;  %v283_v57 = vld [vmem:[#allocation9 + $0x28] sm:$0xff]  ;;  %v284_v59 = vld [vmem:[#allocation9 + $0x30] sm:$0xff] }
  0x57   :  { %v630_v58 = vpack.c.bf16 %v283_v57, %v282_v56  ;;  %v285_v60 = vld [vmem:[#allocation9 + $0x38] sm:$0xff]  ;;  %v286_v62 = vld [vmem:[#allocation9 + $0x40] sm:$0xff]  ;;  %v287_v63 = vld [vmem:[#allocation9 + $0x48] sm:$0xff] }
  0x58   :  { %601 = vmatpush3.bf16.msra.mxu1 %v598_v19  ;;  %v634_v61 = vpack.c.bf16 %v285_v60, %v284_v59  ;;  %v638_v0 = vpack.c.bf16 %v287_v63, %v286_v62  ;;  %v288_v1 = vld [vmem:[#allocation9 + $0x50] sm:$0xff]  ;;  %v289_v2 = vld [vmem:[#allocation9 + $0x58] sm:$0xff]  ;;  %v290_v4 = vld [vmem:[#allocation9 + $0x60] sm:$0xff] }
  0x59   :  { %573 = vmatpush3.bf16.msra.mxu0 %v570_v21  ;;  %603 = vmatprep.subr.bf16.mxu1 %v602_v26  ;;  %v642_v3 = vpack.c.bf16 %v289_v2, %v288_v1  ;;  %v291_v5 = vld [vmem:[#allocation9 + $0x68] sm:$0xff]  ;;  %v292_v7 = vld [vmem:[#allocation9 + $0x70] sm:$0xff]  ;;  %v293_v8 = vld [vmem:[#allocation9 + $0x78] sm:$0xff] }
  0x5a   :  { %575 = vmatprep.subr.bf16.mxu0 %v574_v27  ;;  %v646_v6 = vpack.c.bf16 %v291_v5, %v290_v4  ;;  %v650_v9 = vpack.c.bf16 %v293_v8, %v292_v7 }
  0x5c   :  { %605 = vmatpush3.bf16.msra.mxu1 %v602_v26 }
  0x5d   :  { %577 = vmatpush3.bf16.msra.mxu0 %v574_v27  ;;  %607 = vmatprep.subr.bf16.mxu1 %v606_v32 }
  0x5e   :  { %579 = vmatprep.subr.bf16.mxu0 %v578_v33 }
  0x60   :  { %609 = vmatpush3.bf16.msra.mxu1 %v606_v32 }
  0x61   :  { %581 = vmatpush3.bf16.msra.mxu0 %v578_v33  ;;  %611 = vmatprep.subr.bf16.mxu1 %v610_v38 }
  0x62   :  { %583 = vmatprep.subr.bf16.mxu0 %v582_v39 }
  0x64   :  { %613 = vmatpush3.bf16.msra.mxu1 %v610_v38 }
  0x65   :  { %585 = vmatpush3.bf16.msra.mxu0 %v582_v39  ;;  %615 = vmatprep.subr.bf16.mxu1 %v614_v44 }
  0x66   :  { %587 = vmatprep.subr.bf16.mxu0 %v586_v45 }
  0x68   :  { %617 = vmatpush3.bf16.msra.mxu1 %v614_v44 }
  0x69   :  { %589 = vmatpush3.bf16.msra.mxu0 %v586_v45  ;;  %619 = vmatprep.subr.bf16.mxu1 %v618_v50 }
  0x6a   :  { %623 = vmatprep.subr.bf16.mxu0 %v622_v51 }
  0x6c   :  { %486 = vmatmul.mubr.f32.vlgmr.msra.gmra.mrb[0].mxu0 %v80_v54  ;;  %621 = vmatpush3.bf16.msra.mxu1 %v618_v50 }
  0x6d   :  { %625 = vmatpush3.bf16.msra.mxu0 %v622_v51 }
  0x6e   :  { %627 = vmatprep.subr.bf16.mxu0 %v626_v55 }
  0x6f   :  { %521 = vmatmul.mubr.f32.vlgmr.msra.gmra.mrb[0].mxu1 %v80_v54 }
  0x71   :  { %629 = vmatpush3.bf16.msra.mxu0 %v626_v55 }
  0x72   :  { %631 = vmatprep.subr.bf16.mxu0 %v630_v58 }
  0x75   :  { %633 = vmatpush3.bf16.msra.mxu0 %v630_v58 }
  0x76   :  { %635 = vmatprep.subr.bf16.mxu0 %v634_v61 }
  0x79   :  { %637 = vmatpush3.bf16.msra.mxu0 %v634_v61 }
  0x7a   :  { %639 = vmatprep.subr.bf16.mxu0 %v638_v0 }
  0x7d   :  { %641 = vmatpush3.bf16.msra.mxu0 %v638_v0 }
  0x7e   :  { %643 = vmatprep.subr.bf16.mxu0 %v642_v3 }
  0x81   :  { %645 = vmatpush3.bf16.msra.mxu0 %v642_v3 }
  0x82   :  { %647 = vmatprep.subr.bf16.mxu0 %v646_v6 }
  0x85   :  { %649 = vmatpush3.bf16.msra.mxu0 %v646_v6 }
  0x86   :  { %651 = vmatprep.subr.bf16.mxu0 %v650_v9 }
  0x89   :  { %653 = vmatpush3.bf16.msra.mxu0 %v650_v9 }
 0x13f   :  { %v487_v10 = vpop.f32.mrb[0].mxu0 }
 0x140   :  { %v267_v11 = vmul.f32 0.70710677, %v487_v10  ;;  %v163_v12 = vpop.f32.mrb[1].mxu0  ;;  %v264_v18 = vmul.f32 0.5, %v487_v10 }
 0x141   :  { %v266_v13 = vmul.f32 0.70710677, %v163_v12  ;;  %v263_v20 = vmul.f32 0.5, %v163_v12 }
 0x142   :  { %661 = verf.f32 %v267_v11  ;;  %v522_v14 = vpop.f32.mrb[0].mxu1 }
 0x143   :  { %663 = verf.f32 %v266_v13  ;;  %v254_v15 = vpop.f32.mrb[1].mxu1 }
 0x14c   :  { %v662_v16 = vpop.eup %661 }
 0x14d   :  { %v664_v17 = vpop.eup %663  ;;  %v271_v19 = vadd.f32 1.0, %v662_v16 }
 0x14e   :  { %v270_v21 = vadd.f32 1.0, %v664_v17 }
 0x14f   :  { %v273_v22 = vmul.f32 %v271_v19, %v264_v18 }
 0x150   :  { %v272_v23 = vmul.f32 %v270_v21, %v263_v20 }
 0x151   :  { %v275_v24 = vmul.f32 %v522_v14, %v273_v22 }
 0x152   :  { %v274_v25 = vmul.f32 %v272_v23, %v254_v15 }
 0x154   :  { %555 = vmatprep.mubr.f32.mxu0 %v274_v25 }
 0x155   :  { %556 = vmatmul.mubr.f32.vlgmr.msra.gmra.mrb[2].mxu0 %v275_v24 }
 0x228   :  { %v557_v26 = vpop.f32.mrb[2].mxu0 }
 0x229   :  { %379 = vst [vmem:[#allocation11 + $0x8] sm:$0xff] %v557_v26  ;;  %v360_v27 = vpop.f32.mrb[3].mxu0 }
 0x22a   :  { %378 = vst [vmem:[#allocation11] sm:$0xff] %v360_v27 }
 0x22b   :  { %764 = shalt.err (!%p761_p8)
}
 0x22c   :  { %s765_s15 = scalar_lea.hbm %s908_s4, 256 }
 0x22d   :  { %p766_p9 = scmp.ne.s32.totalorder %s908_s4, %s765_s15  ;;  %p769_p10 = scmp.lt.u32.totalorder %s765_s15, %s908_s4 }
 0x22f   :  { %p771_p11 = pnand %p769_p10, %p766_p9 }
 0x231   :  { %774 = shalt.err (!%p771_p11)
}
 0x232   :  { %391 = dma.vmem_to_hbm [thread:$0]  %s386_s12, 256, %s908_s4, [#allocation5], %s785_s27, %s785_s27, %s786_s28  }
 0x233   :  { %781 = dma.done.wait [#allocation5], 256  }
 0x234   :  { %782 = vsyncadd [#allocation5], 4294967040 }
 0x235   :  { %395 = vsyncpa [#allocation4], 1 }
 0x236   :  { %396 = vsyncpa [#allocation7], 1 }
 0x237   :  { %397 = vsyncpa [#allocation10], 1 }
 0x238   :  { %398 = vsyncpa [#allocation5], 1 }

</bundles_post_ra>
